<compile_context>
chip_gen: v5e
topology: v5e:2x2
jax: 0.10.0
libtpu: 0.0.40
codegen_flags: <defaults>
</compile_context>

<pallas_src>
import jax
import jax.numpy as jnp
import numpy as np
from jax.experimental import pallas as pl
from jax.experimental.pallas import tpu as pltpu


def _divisors(x):
    return [d for d in range(1, x + 1) if x % d == 0]


def loss_rec_burst_pallas(pred_i, ground_truth, *, n_tile=None, b_tile=None):
    """pred_i: [B, N, C, H, W], ground_truth: [B, C, H, W] -> scalar f32 loss."""
    B, N, C, H, W = pred_i.shape
    HW = H * W
    CHW = C * H * W
    itemsize = jnp.dtype(pred_i.dtype).itemsize

    # ---- generation-aware VMEM budget (v7x: 64 MiB/TC, v5e/v6e: 128 MiB) ----
    try:
        vmem_cap = int(pltpu.get_tpu_info().vmem_capacity_bytes)
    except Exception:
        vmem_cap = 64 * 1024 * 1024              # conservative fallback (v7x/TC)
    vmem_limit = min((vmem_cap * 3) // 4, 96 * 1024 * 1024)
    budget = int(vmem_limit * 0.85)              # headroom for Mosaic internals

    def block_vmem_bytes(b_t, n_t):
        pe = b_t * n_t * CHW                     # pred block elements
        ge = b_t * CHW                           # gt block elements
        pred_b = 2 * pe * itemsize + 6 * pe * 4  # 2 pipeline bufs + f32 temps
        gt_b = 2 * ge * itemsize + 5 * ge * 4    # 2 bufs + f32 cast/grad temps
        out_b = 2 * CHW * 4                      # double-buffered partial-sum row
        return pred_b + gt_b + out_b + (64 << 10)

    # ---- burst-frame tile (sublane axis): dtype-aware granularity ----
    sub_gran = {4: 8, 2: 16, 1: 32}.get(itemsize, 8)
    if n_tile is None:
        cands = [d for d in _divisors(N) if d == N or d == 1 or d % sub_gran == 0]
        cands.sort(reverse=True)
        n_tile = cands[-1]
        for d in cands:                          # biggest tile that fits
            if block_vmem_bytes(1, d) <= budget:
                n_tile = d
                break
    assert N % n_tile == 0
    n_steps = N // n_tile

    # ---- batch tile: grow the DMA slab when per-batch work is tiny ----
    if b_tile is None:
        b_tile = 1
        if n_steps == 1:
            target_slab = 2 * 1024 * 1024        # aim for >= 2 MiB native slabs
            for d in sorted(_divisors(B)):
                if block_vmem_bytes(d, n_tile) > budget:
                    break
                b_tile = d
                if d * n_tile * CHW * itemsize >= target_slab:
                    break
    assert B % b_tile == 0
    n_bb = B // b_tile

    # Cache tgrad(gt) across burst steps only when the step axis is iterated
    # sequentially per batch block; otherwise mark both axes 'parallel' so v7x
    # megacore can shard even when the batch-block axis has < 2 programs.
    cache_gt_grad = (n_steps > 1) and (n_bb > 1)
    semantics = ("parallel", "arbitrary") if cache_gt_grad else ("parallel", "parallel")

    # Free reshapes of contiguous NCHW data: lane-dense trailing dim = C*H*W.
    pred3 = pred_i.reshape(B, N, CHW)
    gt3 = ground_truth.reshape(B, 1, CHW)
    denom = float(N) * float(B) * float(CHW)

    def kernel(pred_ref, gt_ref, out_ref, *scratch):
        i = pl.program_id(1)

        # Load native dtype, cast to f32 in vregs.
        p = pred_ref[...].astype(jnp.float32)    # (b_tile, n_tile, CHW)
        g = gt_ref[...].astype(jnp.float32)      # (b_tile, 1,      CHW)

        # Boundary masks on the flattened (c, y, x) lane index.
        lane = jax.lax.broadcasted_iota(jnp.int32, (1, 1, CHW), 2)
        not_x0 = (lane % W) != 0                 # x > 0
        not_y0 = (lane % HW) >= W                # y > 0

        def tgrad(img):
            # img[y, x-1] (0 at x==0) / img[y-1, x] (0 at y==0) via XLU lane
            # rotations; wrapped values land only on masked positions.
            sw = jnp.where(not_x0, pltpu.roll(img, 1, axis=2), 0.0)
            sh = jnp.where(not_y0, pltpu.roll(img, W, axis=2), 0.0)
            return jnp.abs(sw - img) + jnp.abs(sh - img)

        if cache_gt_grad:
            gg_ref = scratch[0]

            @pl.when(i == 0)                     # recompute once per batch block
            def _():
                gg_ref[...] = tgrad(g)

            gg = gg_ref[...]
        else:
            gg = tgrad(g)

        diff = p - g                             # broadcast over burst frames
        gdiff = tgrad(p) - gg
        contrib = diff * diff + jnp.abs(gdiff)

        # Keep the lane axis: reduce only over (b_tile, n_tile) -> VPU vreg adds
        # plus one small sublane reduce; no per-step cross-lane reduction.
        row = jnp.sum(contrib, axis=1, keepdims=True)         # (b_tile, 1, CHW)
        out_ref[...] = jnp.sum(row, axis=0, keepdims=True)    # (1, 1, CHW)

    scratch_shapes = []
    if cache_gt_grad:
        scratch_shapes.append(pltpu.VMEM((b_tile, 1, CHW), jnp.float32))

    cost = pl.CostEstimate(
        flops=int(14 * B * N * CHW),
        transcendentals=0,
        bytes_accessed=int(B * N * CHW * itemsize + B * CHW * itemsize
                           + n_bb * n_steps * CHW * 4),
    )

    out = pl.pallas_call(
        kernel,
        out_shape=jax.ShapeDtypeStruct((n_bb, n_steps, CHW), jnp.float32),
        grid_spec=pltpu.PrefetchScalarGridSpec(
            num_scalar_prefetch=0,
            grid=(n_bb, n_steps),
            in_specs=[
                # (b_tile, n_tile, CHW) burst slab per grid step.
                pl.BlockSpec((b_tile, n_tile, CHW), lambda b, i: (b, i, 0)),
                # Ground truth: index constant over the step axis -> DMA'd once per b.
                pl.BlockSpec((b_tile, 1, CHW), lambda b, i: (b, 0, 0)),
            ],
            # Private lane-dense partial-sum row per (batch block, step):
            # no accumulation, no init gate, race-free under megacore sharding.
            out_specs=pl.BlockSpec((1, 1, CHW), lambda b, i: (b, i, 0)),
            scratch_shapes=tuple(scratch_shapes),
        ),
        compiler_params=pltpu.CompilerParams(
            dimension_semantics=semantics,
            vmem_limit_bytes=int(vmem_limit)),
        cost_estimate=cost,
    )(pred3, gt3)

    # Final cross-lane / cross-block reduction + normalization in the wrapper.
    return jnp.sum(out) / denom


# ---------------- pure-JAX reference (mirrors the PyTorch code) ----------------
def _tensor_gradient_ref(img):
    H, W = img.shape[-2], img.shape[-1]
    pad_w = [(0, 0)] * (img.ndim - 1) + [(1, 0)]
    pad_h = [(0, 0)] * (img.ndim - 2) + [(1, 0), (0, 0)]
    sw = jnp.pad(img, pad_w)[..., :, :W]
    sh = jnp.pad(img, pad_h)[..., :H, :]
    return jnp.abs(sw - img) + jnp.abs(sh - img)


def loss_rec_burst_ref(pred_i, ground_truth):
    N = pred_i.shape[1]
    total = jnp.float32(0.0)
    for i in range(N):
        p = pred_i[:, i]
        total = total + jnp.mean((p - ground_truth) ** 2)
        total = total + jnp.mean(
            jnp.abs(_tensor_gradient_ref(p) - _tensor_gradient_ref(ground_truth)))
    return total / N


if __name__ == "__main__":
    # LossRecBurst has no learnable parameters -> nothing to initialize.
    key = jax.random.PRNGKey(0)
    k1, k2, k3, k4 = jax.random.split(key, 4)

    loss_fn = jax.jit(loss_rec_burst_pallas, static_argnames=("n_tile", "b_tile"))

    # Config 1: default auto-tiling (single step, batch-blocked slab, all-parallel grid).
    B, N, C, H, W = 2, 4, 3, 16, 16
    pred_i = jax.random.normal(k1, (B, N, C, H, W), dtype=jnp.float32)
    gt = jax.random.normal(k2, (B, C, H, W), dtype=jnp.float32)
    out = jax.block_until_ready(loss_fn(pred_i, gt))
    ref = jax.block_until_ready(loss_rec_burst_ref(pred_i, gt))
    np.testing.assert_allclose(np.asarray(out), np.asarray(ref), rtol=2e-5, atol=2e-5)

    # Config 2: multi-step burst axis -> exercises the cached-gt-gradient path
    # ("parallel", "arbitrary") with per-(batch, step) private output rows.
    B2, N2 = 2, 16
    pred_i2 = jax.random.normal(k3, (B2, N2, C, H, W), dtype=jnp.float32)
    gt2 = jax.random.normal(k4, (B2, C, H, W), dtype=jnp.float32)
    out2 = jax.block_until_ready(loss_fn(pred_i2, gt2, n_tile=8, b_tile=1))
    ref2 = jax.block_until_ready(loss_rec_burst_ref(pred_i2, gt2))
    np.testing.assert_allclose(np.asarray(out2), np.asarray(ref2), rtol=2e-5, atol=2e-5)

    print("KERNEL_OK")
</pallas_src>

<mosaic_0001>
module attributes {stable_mosaic.version = 11 : i64} {
  func.func @kernel(%arg0: i32, %arg1: i32, %arg2: memref<2x4x768xf32, #tpu.memory_space<vmem>>, %arg3: memref<2x1x768xf32, #tpu.memory_space<vmem>>, %arg4: memref<1x1x768xf32, #tpu.memory_space<vmem>>) attributes {dimension_semantics = [#tpu.dimension_semantics<parallel>, #tpu.dimension_semantics<parallel>], iteration_bounds = array<i64: 1, 1>, scalar_prefetch = 0 : i64, scratch_operands = 0 : i64, tpu.core_type = #tpu.core_type<tc>, window_params = [{transform_indices = @transform_0, window_bounds = array<i64: 2, 4, 768>}, {transform_indices = @transform_1, window_bounds = array<i64: 2, 1, 768>}, {transform_indices = @transform_2, window_bounds = array<i64: 1, 1, 768>}]} {
    %c0 = arith.constant 0 : index
    %c0_0 = arith.constant 0 : index
    %c0_1 = arith.constant 0 : index
    %0 = vector.load %arg2[%c0, %c0_0, %c0_1] : memref<2x4x768xf32, #tpu.memory_space<vmem>>, vector<2x4x768xf32>
    %c0_2 = arith.constant 0 : index
    %c0_3 = arith.constant 0 : index
    %c0_4 = arith.constant 0 : index
    %1 = vector.load %arg3[%c0_2, %c0_3, %c0_4] : memref<2x1x768xf32, #tpu.memory_space<vmem>>, vector<2x1x768xf32>
    %2 = tpu.iota {dimensions = array<i32: 2>} : vector<1x1x768xi32>
    %c16_i32 = arith.constant 16 : i32
    %c0_i32 = arith.constant 0 : i32
    %3 = arith.cmpi eq, %c16_i32, %c0_i32 : i32
    %c1_i32 = arith.constant 1 : i32
    %4 = arith.select %3, %c1_i32, %c16_i32 : i32
    %5 = vector.broadcast %4 : i32 to vector<1x1x768xi32>
    %6 = arith.remsi %2, %5 : vector<1x1x768xi32>
    %c0_i32_5 = arith.constant 0 : i32
    %7 = vector.broadcast %c0_i32_5 : i32 to vector<1x1x768xi32>
    %8 = arith.cmpi ne, %6, %7 : vector<1x1x768xi32>
    %c0_i32_6 = arith.constant 0 : i32
    %9 = vector.broadcast %c0_i32_6 : i32 to vector<1x1x768xi32>
    %10 = arith.cmpi slt, %6, %9 : vector<1x1x768xi32>
    %c0_i32_7 = arith.constant 0 : i32
    %11 = arith.cmpi slt, %4, %c0_i32_7 : i32
    %12 = vector.broadcast %11 : i1 to vector<1x1x768xi1>
    %13 = vector.broadcast %12 : vector<1x1x768xi1> to vector<1x1x768xi1>
    %14 = arith.xori %10, %13 : vector<1x1x768xi1>
    %15 = arith.andi %14, %8 : vector<1x1x768xi1>
    %16 = vector.broadcast %4 : i32 to vector<1x1x768xi32>
    %17 = arith.addi %6, %16 : vector<1x1x768xi32>
    %18 = arith.select %15, %17, %6 : vector<1x1x768xi1>, vector<1x1x768xi32>
    %c0_i32_8 = arith.constant 0 : i32
    %19 = vector.broadcast %c0_i32_8 : i32 to vector<1x1x768xi32>
    %20 = arith.cmpi ne, %18, %19 : vector<1x1x768xi32>
    %c256_i32 = arith.constant 256 : i32
    %c0_i32_9 = arith.constant 0 : i32
    %21 = arith.cmpi eq, %c256_i32, %c0_i32_9 : i32
    %c1_i32_10 = arith.constant 1 : i32
    %22 = arith.select %21, %c1_i32_10, %c256_i32 : i32
    %23 = vector.broadcast %22 : i32 to vector<1x1x768xi32>
    %24 = arith.remsi %2, %23 : vector<1x1x768xi32>
    %c0_i32_11 = arith.constant 0 : i32
    %25 = vector.broadcast %c0_i32_11 : i32 to vector<1x1x768xi32>
    %26 = arith.cmpi ne, %24, %25 : vector<1x1x768xi32>
    %c0_i32_12 = arith.constant 0 : i32
    %27 = vector.broadcast %c0_i32_12 : i32 to vector<1x1x768xi32>
    %28 = arith.cmpi slt, %24, %27 : vector<1x1x768xi32>
    %c0_i32_13 = arith.constant 0 : i32
    %29 = arith.cmpi slt, %22, %c0_i32_13 : i32
    %30 = vector.broadcast %29 : i1 to vector<1x1x768xi1>
    %31 = vector.broadcast %30 : vector<1x1x768xi1> to vector<1x1x768xi1>
    %32 = arith.xori %28, %31 : vector<1x1x768xi1>
    %33 = arith.andi %32, %26 : vector<1x1x768xi1>
    %34 = vector.broadcast %22 : i32 to vector<1x1x768xi32>
    %35 = arith.addi %24, %34 : vector<1x1x768xi32>
    %36 = arith.select %33, %35, %24 : vector<1x1x768xi1>, vector<1x1x768xi32>
    %c16_i32_14 = arith.constant 16 : i32
    %37 = vector.broadcast %c16_i32_14 : i32 to vector<1x1x768xi32>
    %38 = arith.cmpi sge, %36, %37 : vector<1x1x768xi32>
    %c1_i32_15 = arith.constant 1 : i32
    %39 = tpu.dynamic_rotate %1 by %c1_i32_15 dim 2 : vector<2x1x768xf32>, i32 -> vector<2x1x768xf32>
    %cst = arith.constant 0.000000e+00 : f32
    %40 = vector.shape_cast %20 : vector<1x1x768xi1> to vector<1x1x768xi1>
    %41 = vector.broadcast %40 : vector<1x1x768xi1> to vector<2x1x768xi1>
    %42 = vector.broadcast %cst : f32 to vector<2x1x768xf32>
    %43 = arith.select %41, %39, %42 : vector<2x1x768xi1>, vector<2x1x768xf32>
    %c16_i32_16 = arith.constant 16 : i32
    %44 = tpu.dynamic_rotate %1 by %c16_i32_16 dim 2 : vector<2x1x768xf32>, i32 -> vector<2x1x768xf32>
    %cst_17 = arith.constant 0.000000e+00 : f32
    %45 = vector.shape_cast %38 : vector<1x1x768xi1> to vector<1x1x768xi1>
    %46 = vector.broadcast %45 : vector<1x1x768xi1> to vector<2x1x768xi1>
    %47 = vector.broadcast %cst_17 : f32 to vector<2x1x768xf32>
    %48 = arith.select %46, %44, %47 : vector<2x1x768xi1>, vector<2x1x768xf32>
    %49 = arith.subf %43, %1 : vector<2x1x768xf32>
    %50 = math.absf %49 : vector<2x1x768xf32>
    %51 = arith.subf %48, %1 : vector<2x1x768xf32>
    %52 = math.absf %51 : vector<2x1x768xf32>
    %53 = arith.addf %50, %52 : vector<2x1x768xf32>
    %54 = vector.broadcast %1 : vector<2x1x768xf32> to vector<2x4x768xf32>
    %55 = arith.subf %0, %54 : vector<2x4x768xf32>
    %c1_i32_18 = arith.constant 1 : i32
    %56 = tpu.dynamic_rotate %0 by %c1_i32_18 dim 2 : vector<2x4x768xf32>, i32 -> vector<2x4x768xf32>
    %cst_19 = arith.constant 0.000000e+00 : f32
    %57 = vector.shape_cast %20 : vector<1x1x768xi1> to vector<1x1x768xi1>
    %58 = vector.broadcast %57 : vector<1x1x768xi1> to vector<2x4x768xi1>
    %59 = vector.broadcast %cst_19 : f32 to vector<2x4x768xf32>
    %60 = arith.select %58, %56, %59 : vector<2x4x768xi1>, vector<2x4x768xf32>
    %c16_i32_20 = arith.constant 16 : i32
    %61 = tpu.dynamic_rotate %0 by %c16_i32_20 dim 2 : vector<2x4x768xf32>, i32 -> vector<2x4x768xf32>
    %cst_21 = arith.constant 0.000000e+00 : f32
    %62 = vector.shape_cast %38 : vector<1x1x768xi1> to vector<1x1x768xi1>
    %63 = vector.broadcast %62 : vector<1x1x768xi1> to vector<2x4x768xi1>
    %64 = vector.broadcast %cst_21 : f32 to vector<2x4x768xf32>
    %65 = arith.select %63, %61, %64 : vector<2x4x768xi1>, vector<2x4x768xf32>
    %66 = arith.subf %60, %0 : vector<2x4x768xf32>
    %67 = math.absf %66 : vector<2x4x768xf32>
    %68 = arith.subf %65, %0 : vector<2x4x768xf32>
    %69 = math.absf %68 : vector<2x4x768xf32>
    %70 = arith.addf %67, %69 : vector<2x4x768xf32>
    %71 = vector.broadcast %53 : vector<2x1x768xf32> to vector<2x4x768xf32>
    %72 = arith.subf %70, %71 : vector<2x4x768xf32>
    %73 = arith.mulf %55, %55 : vector<2x4x768xf32>
    %74 = math.absf %72 : vector<2x4x768xf32>
    %75 = arith.addf %73, %74 : vector<2x4x768xf32>
    %cst_22 = arith.constant dense<0.000000e+00> : vector<2x768xf32>
    %76 = vector.multi_reduction <add>, %75, %cst_22 [1] : vector<2x4x768xf32> to vector<2x768xf32>
    %77 = vector.shape_cast %76 : vector<2x768xf32> to vector<2x1x768xf32>
    %cst_23 = arith.constant dense<0.000000e+00> : vector<1x768xf32>
    %78 = vector.multi_reduction <add>, %77, %cst_23 [0] : vector<2x1x768xf32> to vector<1x768xf32>
    %79 = vector.shape_cast %78 : vector<1x768xf32> to vector<1x1x768xf32>
    %c0_24 = arith.constant 0 : index
    %c0_25 = arith.constant 0 : index
    %c0_26 = arith.constant 0 : index
    %80 = vector.load %arg4[%c0_24, %c0_25, %c0_26] : memref<1x1x768xf32, #tpu.memory_space<vmem>>, vector<1x1x768xf32>
    tpu.vector_store %arg4[%c0_24, %c0_25, %c0_26], %79 {strides = array<i32>} : memref<1x1x768xf32, #tpu.memory_space<vmem>>, vector<1x1x768xf32>,
    return
  }
  func.func @transform_0(%arg0: i32, %arg1: i32) -> (i32, i32, i32) {
    %c0_i32 = arith.constant 0 : i32
    %c0_i32_0 = arith.constant 0 : i32
    return %arg0, %arg1, %c0_i32 : i32, i32, i32
  }
  func.func @transform_1(%arg0: i32, %arg1: i32) -> (i32, i32, i32) {
    %c0_i32 = arith.constant 0 : i32
    %c0_i32_0 = arith.constant 0 : i32
    %c0_i32_1 = arith.constant 0 : i32
    return %arg0, %c0_i32, %c0_i32_0 : i32, i32, i32
  }
  func.func @transform_2(%arg0: i32, %arg1: i32) -> (i32, i32, i32) {
    %c0_i32 = arith.constant 0 : i32
    %c0_i32_0 = arith.constant 0 : i32
    return %arg0, %arg1, %c0_i32 : i32, i32, i32
  }
}

</mosaic_0001>

<bundles_post_ra>
// kernel: loss_rec_burst_pallas.1
= control target key start
LH: loop header
LB: loop body
LE: loop exit
PB: predicated region body
PF: predicated region fallthrough
CT: control target
= control target key end

     0   :  { %s949_s11 = smov 1   ;;  %s950_s23 = smov 16   ;;  %v1640_v47 = vlaneseq  ;;  %vm396_vm9 = vcmask 1043456   ;;  %vm927_vm12 = vcmask 1040384   ;;  %vm929_vm13 = vcmask 1041408   ;;  %s1637_s1 = inlined_call_operand.vmem [shape: f32[2,1,768], index: 1, kind: input, shape index: {}]   ;;  %s1638_s0 = inlined_call_operand.vmem [shape: f32[2,4,768], index: 0, kind: input, shape index: {}]   ;;  %s1639_s2 = inlined_call_operand.vmem [shape: f32[1,1,768], index: 2, kind: output, shape index: {}]  }
   0x1   :  { %v17_v0 = vld [vmem:[%s1637_s1] sm:$0x3f]  ;;  %v18_v5 = vld [vmem:[%s1637_s1 + $0x6] sm:$0x3f]  ;;  %v1048_v24 = vld [vmem:[%s1638_s0 + $0x10] sm:$0xff]  ;;  %vm931_vm14 = vcmask 1043459  }
   0x2   :  { %v969_v1 = vperm.slane %v17_v0, 2  ;;  %v971_v2 = vperm.slane %v17_v0, 1  ;;  %v973_v3 = vperm.slane %v17_v0, 0  ;;  %v982_v4 = vld [vmem:[%s1638_s0] sm:$0xff]  ;;  %v990_v6 = vperm.slane %v18_v5, 2  ;;  %v1008_v11 = vld [vmem:[%s1638_s0 + $0x8] sm:$0xff] }
   0x3   :  { %421 = vst [vmem:[#allocation1] ss:$2 sm:$0xff] %v982_v4  ;;  %v992_v7 = vperm.slane %v18_v5, 1  ;;  %v994_v8 = vperm.slane %v18_v5, 0  ;;  %v1003_v10 = vld [vmem:[%s1638_s0 + $0x20] sm:$0xff]  ;;  %v1014_v13 = vperm.slane %v17_v0, 4 }
   0x4   :  { %216 = vrot.lane.b32.xlu2 %v969_v1, %s949_s11  ;;  %212 = vrot.lane.b32.xlu1 %v971_v2, %s949_s11  ;;  %1652 = vst [vmem:[#allocation2_spill] sm:$0xff] %v990_v6  ;;  %v1016_v14 = vperm.slane %v18_v5, 3  ;;  %v1018_v15 = vperm.slane %v17_v0, 3  ;;  %v1027_v17 = vld [vmem:[%s1638_s0 + $0x28] sm:$0xff]  ;;  %v1035_v21 = vperm.slane %v18_v5, 5  ;;  %v1037_v22 = vperm.slane %v17_v0, 5 }
   0x5   :  { %208 = vrot.lane.b32.xlu0 %v973_v3, %s949_s11  ;;  %1653 = vst [vmem:[#allocation3_spill] sm:$0xff] %v992_v7  ;;  %v1039_v23 = vperm.slane %v18_v5, 4  ;;  %v1074_v33 = vld [vmem:[%s1638_s0 + $0x18] sm:$0xff]  ;;  %v1114_v48 = vand.u32 127, %v1640_v47  ;;  %vm933_vm15 = vcmask 1044483  }
   0x6   :  { %1654 = vst [vmem:[#allocation4_spill] sm:$0xff] %v1003_v10 }
   0x7   :  { %423 = vst [vmem:[#allocation1 + $0x10] ss:$2 sm:$0xff] %v1008_v11  ;;  %vm232_vm0 = vcmp.lt.s32.totalorder %v1114_v48, 1  ;;  %vm293_vm2 = vcmp.lt.s32.totalorder %v1114_v48, 16 }
   0x8   :  { %1655 = vst [vmem:[#allocation5_spill] sm:$0xff] %v1027_v17 }
   0x9   :  { %1656 = vst [vmem:[#allocation6_spill] sm:$0xff] %v1035_v21 }
   0xa   :  { %v427_v9 = vld.sshfl [vmem:[#allocation1 + $0x8] sm:$0xff pattern:$0x75316420]  ;;  %v426_v12 = vld.sshfl [vmem:[#allocation1] sm:$0xff pattern:$0x75316420] }
   0xb   :  { %436 = vst [vmem:[#allocation1] ss:$2 sm:$0xff] %v1003_v10 }
   0xc   :  { %218 = vrot.lane.b32.xlu2 %v990_v6, %s949_s11  ;;  %214 = vrot.lane.b32.xlu1 %v992_v7, %s949_s11  ;;  %1657 = vst [vmem:[#allocation7_spill] sm:$0xff] %v1039_v23 }
   0xd   :  { %210 = vrot.lane.b32.xlu0 %v994_v8, %s949_s11  ;;  %1658 = vst [vmem:[#allocation8_spill] sm:$0xff] %v1048_v24 }
   0xe   :  { %v428_v16 = vld.sshfl [vmem:[#allocation1 + $0x10] sm:$0xff pattern:$0x75316420]  ;;  %v429_v18 = vld.sshfl [vmem:[#allocation1 + $0x18] sm:$0xff pattern:$0x75316420] }
   0xf   :  { %437 = vst [vmem:[#allocation1 + $0x10] ss:$2 sm:$0xff] %v1027_v17 }
  0x10   :  { %425 = vst [vmem:[#allocation1 + $0x20] ss:$2 sm:$0xff] %v1048_v24 }
  0x11   :  { %433 = vst [vmem:[#allocation1 + $0x30] ss:$2 sm:$0xff] %v1074_v33 }
  0x12   :  { %v1031_v19 = vld.sshfl [vmem:[#allocation1] sm:$0xff pattern:$0x75316420]  ;;  %v439_v20 = vld.sshfl [vmem:[#allocation1 + $0x8] sm:$0xff pattern:$0x75316420] }
  0x13   :  { %502 = vst [vmem:[#allocation1] ss:$2 sm:$0xff] %v982_v4 }
  0x14   :  { %224 = vrot.lane.b32.xlu2 %v1014_v13, %s949_s11  ;;  %222 = vrot.lane.b32.xlu1 %v1016_v14, %s949_s11 }
  0x15   :  { %220 = vrot.lane.b32.xlu0 %v1018_v15, %s949_s11 }
  0x16   :  { %v440_v25 = vld.sshfl [vmem:[#allocation1 + $0x10] sm:$0xff pattern:$0x75316420]  ;;  %v441_v26 = vld.sshfl [vmem:[#allocation1 + $0x18] sm:$0xff pattern:$0x75316420] }
  0x17   :  { %504 = vst [vmem:[#allocation1 + $0x10] ss:$2 sm:$0xff] %v1008_v11  ;;  %v430_v31 = vld.sshfl [vmem:[#allocation1 + $0x20] sm:$0xff pattern:$0x75316420] }
  0x18   :  { %v431_v32 = vld.sshfl [vmem:[#allocation1 + $0x28] sm:$0xff pattern:$0x75316420]  ;;  %v434_v34 = vld.sshfl [vmem:[#allocation1 + $0x30] sm:$0xff pattern:$0x75316420] }
  0x19   :  { %506 = vst [vmem:[#allocation1 + $0x20] ss:$2 sm:$0xff] %v1048_v24  ;;  %v435_v35 = vld.sshfl [vmem:[#allocation1 + $0x38] sm:$0xff pattern:$0x75316420] }
  0x1a   :  { %v507_v27 = vld.sshfl [vmem:[#allocation1] sm:$0xff pattern:$0x75316420]  ;;  %v508_v28 = vld.sshfl [vmem:[#allocation1 + $0x8] sm:$0xff pattern:$0x75316420] }
  0x1b   :  { %517 = vst [vmem:[#allocation1] ss:$2 sm:$0xff] %v1003_v10 }
  0x1c   :  { %230 = vrot.lane.b32.xlu2 %v1035_v21, %s949_s11  ;;  %228 = vrot.lane.b32.xlu1 %v1037_v22, %s949_s11  ;;  %514 = vst [vmem:[#allocation1 + $0x30] ss:$2 sm:$0xff] %v1074_v33 }
  0x1d   :  { %226 = vrot.lane.b32.xlu0 %v1039_v23, %s949_s11 }
  0x1e   :  { %v509_v29 = vld.sshfl [vmem:[#allocation1 + $0x10] sm:$0xff pattern:$0x75316420]  ;;  %v510_v30 = vld.sshfl [vmem:[#allocation1 + $0x18] sm:$0xff pattern:$0x75316420] }
  0x1f   :  { %518 = vst [vmem:[#allocation1 + $0x10] ss:$2 sm:$0xff] %v1027_v17 }
  0x20   :  { %v512_v36 = vld.sshfl [vmem:[#allocation1 + $0x28] sm:$0xff pattern:$0x75316420]  ;;  %v511_v40 = vld.sshfl [vmem:[#allocation1 + $0x20] sm:$0xff pattern:$0x75316420] }
  0x21   :  { %587 = vst [vmem:[#allocation1 + $0x20] ss:$2 sm:$0xff] %v1048_v24 }
  0x22   :  { %v519_v39 = vld.sshfl [vmem:[#allocation1] sm:$0xff pattern:$0x75316420]  ;;  %v520_v41 = vld.sshfl [vmem:[#allocation1 + $0x8] sm:$0xff pattern:$0x75316420] }
  0x23   :  { %v516_v37 = vld.sshfl [vmem:[#allocation1 + $0x38] sm:$0xff pattern:$0x75316420]  ;;  %v515_v38 = vld.sshfl [vmem:[#allocation1 + $0x30] sm:$0xff pattern:$0x75316420] }
  0x24   :  { %273 = vrot.lane.b32.xlu2 %v971_v2, %s950_s23  ;;  %271 = vrot.lane.b32.xlu1 %v994_v8, %s950_s23  ;;  %595 = vst [vmem:[#allocation1 + $0x30] ss:$2 sm:$0xff] %v1074_v33 }
  0x25   :  { %269 = vrot.lane.b32.xlu0 %v973_v3, %s950_s23  ;;  %583 = vst [vmem:[#allocation1] ss:$2 sm:$0xff] %v982_v4 }
  0x26   :  { %v521_v43 = vld.sshfl [vmem:[#allocation1 + $0x10] sm:$0xff pattern:$0x75316420]  ;;  %v522_v44 = vld.sshfl [vmem:[#allocation1 + $0x18] sm:$0xff pattern:$0x75316420] }
  0x27   :  { %585 = vst [vmem:[#allocation1 + $0x10] ss:$2 sm:$0xff] %v1008_v11 }
  0x2c   :  { %281 = vrot.lane.b32.xlu2 %v1018_v15, %s950_s23  ;;  %277 = vrot.lane.b32.xlu1 %v969_v1, %s950_s23  ;;  %v1145_v59 = vld.sshfl [vmem:[#allocation1] sm:$0xff pattern:$0x75316420]  ;;  %v1160_v5 = vld.sshfl [vmem:[#allocation1 + $0x8] sm:$0xff pattern:$0x75316420] }
  0x2d   :  { %275 = vrot.lane.b32.xlu0 %v992_v7, %s950_s23  ;;  %598 = vst [vmem:[#allocation1] ss:$2 sm:$0xff] %v1003_v10 }
  0x34   :  { %458 = vrot.lane.b32.xlu2 %v427_v9, %s949_s11  ;;  %454 = vrot.lane.b32.xlu1 %v426_v12, %s949_s11  ;;  %v1163_v9 = vld.sshfl [vmem:[#allocation1 + $0x10] sm:$0xff pattern:$0x75316420]  ;;  %v1165_v12 = vld.sshfl [vmem:[#allocation1 + $0x18] sm:$0xff pattern:$0x75316420] }
  0x35   :  { %289 = vrot.lane.b32.xlu0 %v1037_v22, %s950_s23  ;;  %599 = vst [vmem:[#allocation1 + $0x10] ss:$2 sm:$0xff] %v1027_v17 }
  0x3c   :  { %466 = vrot.lane.b32.xlu1 %v429_v18, %s949_s11  ;;  %535 = vrot.lane.b32.xlu2 %v507_v27, %s950_s23  ;;  %v1185_v27 = vld.sshfl [vmem:[#allocation1] sm:$0xff pattern:$0x75316420] }
  0x3d   :  { %462 = vrot.lane.b32.xlu0 %v428_v16, %s949_s11  ;;  %1660 = vst [vmem:[#allocation10_spill] sm:$0xff] %v1185_v27 }
  0x44   :  { %543 = vrot.lane.b32.xlu1 %v509_v29, %s950_s23  ;;  %547 = vrot.lane.b32.xlu2 %v510_v30, %s950_s23  ;;  %v21_v29 = vadd.s32 128, %v1114_v48  ;;  %v1191_v30 = vld.sshfl [vmem:[#allocation1 + $0x10] sm:$0xff pattern:$0x75316420] }
  0x45   :  { %539 = vrot.lane.b32.xlu0 %v508_v28, %s950_s23  ;;  %v1187_v28 = vld.sshfl [vmem:[#allocation1 + $0x8] sm:$0xff pattern:$0x75316420]  ;;  %1662 = vst [vmem:[#allocation12_spill] sm:$0xff] %v1191_v30 }
  0x46   :  { %1661 = vst [vmem:[#allocation11_spill] sm:$0xff] %v1187_v28 }
  0x47   :  { %640 = vst [vmem:[#allocation1] ss:$2 sm:$0xff] %v982_v4 }
  0x4c   :  { %555 = vrot.lane.b32.xlu1 %v512_v36, %s950_s23  ;;  %279 = vrot.lane.b32.xlu2 %v990_v6, %s950_s23 }
  0x4d   :  { %474 = vrot.lane.b32.xlu0 %v431_v32, %s949_s11 }
  0x54   :  { %285 = vrot.lane.b32.xlu1 %v1014_v13, %s950_s23  ;;  %287 = vrot.lane.b32.xlu2 %v1039_v23, %s950_s23 }
  0x55   :  { %283 = vrot.lane.b32.xlu0 %v1016_v14, %s950_s23 }
  0x5c   :  { %456 = vrot.lane.b32.xlu1 %v434_v34, %s949_s11  ;;  %460 = vrot.lane.b32.xlu2 %v435_v35, %s949_s11  ;;  %v37_v35 = vand.u32 15, %v21_v29  ;;  %v23_v29 = vadd.s32 384, %v1114_v48 }
  0x5d   :  { %291 = vrot.lane.b32.xlu0 %v1035_v21, %s950_s23 }
  0x5e   :  { %v1102_v42 = vpop.permute.xlu2 %216  ;;  %vm1203_vm1 = vcmp.ne.s32.totalorder %v37_v35, 0 }
  0x64   :  { %468 = vrot.lane.b32.xlu1 %v439_v20, %s949_s11  ;;  %470 = vrot.lane.b32.xlu2 %v430_v31, %s949_s11  ;;  %v1193_v31 = vld.sshfl [vmem:[#allocation1 + $0x18] sm:$0xff pattern:$0x75316420] }
  0x65   :  { %464 = vrot.lane.b32.xlu0 %v1031_v19, %s949_s11  ;;  %1663 = vst [vmem:[#allocation13_spill] sm:$0xff] %v1193_v31  ;;  %v1237_v31 = vld.sshfl [vmem:[#allocation1 + $0x28] sm:$0xff pattern:$0x75316420] }
  0x66   :  { %v219_v45 = vpop.permute.xlu2 %218  ;;  %642 = vst [vmem:[#allocation1 + $0x10] ss:$2 sm:$0xff] %v1008_v11 }
  0x67   :  { %1670 = vst [vmem:[#allocation16_spill] sm:$0xff] %v1237_v31 }
  0x6c   :  { %476 = vrot.lane.b32.xlu1 %v441_v26, %s949_s11  ;;  %537 = vrot.lane.b32.xlu2 %v515_v38, %s950_s23  ;;  %v1664_v38 = vmov 0 }
  0x6d   :  { %472 = vrot.lane.b32.xlu0 %v440_v25, %s949_s11  ;;  %v1665_v38 = vsel %vm1203_vm1, 4294967295, %v1664_v38 }
  0x6e   :  { %v225_v46 = vpop.permute.xlu2 %224  ;;  %1666 = vst [vmem:[#allocation14_spill] sm:$0xff] %v1665_v38 }
  0x74   :  { %545 = vrot.lane.b32.xlu1 %v519_v39, %s950_s23  ;;  %549 = vrot.lane.b32.xlu2 %v520_v41, %s950_s23  ;;  %v1211_v41 = vld.sshfl [vmem:[#allocation1 + $0x10] sm:$0xff pattern:$0x75316420] }
  0x75   :  { %541 = vrot.lane.b32.xlu0 %v516_v37, %s950_s23  ;;  %v22_v37 = vadd.s32 256, %v1114_v48 }
  0x76   :  { %v231_v49 = vpop.permute.xlu2 %230  ;;  %v1120_v50 = vpop.permute.xlu1 %212 }
  0x77   :  { %v1122_v51 = vpop.permute.xlu0 %208  ;;  %v122_v47 = vand.u32 255, %v22_v37 }
  0x78   :  { %v1128_v52 = vsel %vm232_vm0, %v1122_v51, %v1120_v50 }
  0x79   :  { %vm1247_vm4 = vcmp.ge.s32.totalorder %v122_v47, 16  ;;  %v239_v47 = vsel %vm232_vm0, %v1120_v50, %v1102_v42 }
  0x7c   :  { %553 = vrot.lane.b32.xlu1 %v521_v43, %s950_s23  ;;  %557 = vrot.lane.b32.xlu2 %v522_v44, %s950_s23  ;;  %v44_v43 = vand.u32 15, %v22_v37 }
  0x7d   :  { %551 = vrot.lane.b32.xlu0 %v511_v40, %s950_s23  ;;  %v1209_v40 = vld.sshfl [vmem:[#allocation1 + $0x18] sm:$0xff pattern:$0x75316420] }
  0x7e   :  { %v1133_v53 = vpop.permute.xlu2 %273  ;;  %v215_v54 = vpop.permute.xlu1 %214  ;;  %656 = vst [vmem:[#allocation1 + $0x10] ss:$2 sm:$0xff] %v1027_v17  ;;  %vm1226_vm3 = vcmp.ne.s32.totalorder %v44_v43, 0  ;;  %v51_v43 = vand.u32 15, %v23_v29 }
  0x7f   :  { %v1137_v55 = vsel %vm232_vm0, %v215_v54, %v219_v45  ;;  %v211_v56 = vpop.permute.xlu0 %210 }
  0x80   :  { %v242_v57 = vsel %vm232_vm0, %v211_v56, %v215_v54  ;;  %v1143_v58 = vsel %vm232_vm0, %v231_v49, %v211_v56  ;;  %v265_v35 = vsel %vm1226_vm3, %v1137_v55, 0.0  ;;  %vm1267_vm5 = vcmp.ne.s32.totalorder %v51_v43, 0 }
  0x81   :  { %v264_v39 = vsel %vm1203_vm1, %v242_v57, 0.0  ;;  %v1222_v57 = vld.sshfl [vmem:[#allocation1 + $0x8] sm:$0xff pattern:$0x75316420]  ;;  %v259_v43 = vsel %vm1226_vm3, %v239_v47, 0.0 }
  0x86   :  { %v1147_v60 = vpop.permute.xlu2 %281  ;;  %v223_v61 = vpop.permute.xlu1 %222 }
  0x87   :  { %v1151_v62 = vsel %vm232_vm0, %v219_v45, %v223_v61  ;;  %v1153_v63 = vpop.permute.xlu0 %220 }
  0x88   :  { %v1158_v0 = vsel %vm232_vm0, %v1153_v63, %v225_v46 }
  0x8e   :  { %v1168_v16 = vpop.permute.xlu1 %228  ;;  %v1170_v18 = vpop.permute.xlu2 %458 }
  0x8f   :  { %v1175_v19 = vsel %vm232_vm0, %v225_v46, %v1168_v16  ;;  %v227_v20 = vpop.permute.xlu0 %226  ;;  %v337_v46 = vsub.f32 %v264_v39, %v992_v7 }
  0x90   :  { %v1179_v25 = vsel %vm232_vm0, %v227_v20, %v231_v49  ;;  %v1183_v26 = vsel %vm232_vm0, %v223_v61, %v227_v20  ;;  %v1224_v61 = vld.sshfl [vmem:[#allocation1] sm:$0xff pattern:$0x75316420] }
  0x91   :  { %1659 = vst [vmem:[#allocation9_spill] sm:$0xff] %v1179_v25  ;;  %v349_v39 = vand.u32 2147483647, %v337_v46 }
  0x92   :  { %655 = vst [vmem:[#allocation1] ss:$2 sm:$0xff] %v1003_v10  ;;  %v338_v10 = vsub.f32 %v265_v35, %v990_v6  ;;  %v30_v35 = vand.u32 15, %v1114_v48 }
  0x94   :  { %vm1300_vm6 = vcmp.ne.s32.totalorder %v30_v35, 0 }
  0x96   :  { %v1195_v32 = vpop.permute.xlu1 %271  ;;  %v1197_v34 = vpop.permute.xlu2 %535 }
  0x97   :  { %v1200_v36 = vpop.permute.xlu0 %269 }
  0x9e   :  { %v278_v44 = vpop.permute.xlu1 %277  ;;  %v1213_v45 = vpop.permute.xlu2 %547 }
  0x9f   :  { %v276_v49 = vpop.permute.xlu0 %275 }
  0xa0   :  { %v303_v54 = vsel %vm293_vm2, %v1195_v32, %v276_v49 }
  0xa1   :  { %v361_v56 = vsub.f32 %v303_v54, %v992_v7  ;;  %v1235_v54 = vld.sshfl [vmem:[#allocation1 + $0x20] sm:$0xff pattern:$0x75316420]  ;;  %v391_v7 = vrot.slane %v1018_v15, 4 }
  0xa2   :  { %1669 = vst [vmem:[#allocation15_spill] sm:$0xff] %v1235_v54 }
  0xa3   :  { %v373_v17 = vand.u32 2147483647, %v361_v56  ;;  %644 = vst [vmem:[#allocation1 + $0x20] ss:$2 sm:$0xff] %v1048_v24  ;;  %v300_v56 = vsel %vm293_vm2, %v1133_v53, %v278_v44 }
  0xa4   :  { %v320_v50 = vsel %vm1247_vm4, %v300_v56, 0.0 }
  0xa5   :  { %v1239_v30 = vadd.f32 %v373_v17, %v349_v39 }
  0xa6   :  { %v1242_v27 = vpop.permute.xlu1 %454  ;;  %v1244_v28 = vpop.permute.xlu2 %279 }
  0xa7   :  { %1671 = vst [vmem:[#allocation17_spill] sm:$0xff] %v1239_v30  ;;  %v1251_v37 = vpop.permute.xlu0 %289  ;;  %v301_v17 = vsel %vm293_vm2, %v276_v49, %v1244_v28  ;;  %v350_v49 = vand.u32 2147483647, %v338_v10  ;;  %v108_v10 = vand.u32 255, %v1114_v48  ;;  %v486_v35 = vsel %vm232_vm0, %v1242_v27, %v1170_v18 }
  0xa8   :  { %v326_v46 = vsel %vm1247_vm4, %v301_v17, 0.0  ;;  %v237_v17 = vsel %vm232_vm0, %v1102_v42, %v1153_v63  ;;  %v258_v42 = vsel %vm1203_vm1, %v1128_v52, 0.0  ;;  %v1305_v52 = vadd.s32 512, %v1114_v48 }
  0xa9   :  { %v362_v29 = vsub.f32 %v326_v46, %v990_v6  ;;  %v298_v46 = vsel %vm293_vm2, %v278_v44, %v1147_v60  ;;  %v25_v6 = vadd.s32 640, %v1114_v48  ;;  %v260_v63 = vsel %vm1267_vm5, %v237_v17, 0.0 }
  0xaa   :  { %v243_v44 = vsel %vm232_vm0, %v1168_v16, %v1122_v51  ;;  %v357_v56 = vsub.f32 %v298_v46, %v1018_v15  ;;  %v356_v51 = vsub.f32 %v320_v50, %v969_v1  ;;  %v332_v17 = vsub.f32 %v259_v43, %v969_v1 }
  0xab   :  { %v374_v24 = vand.u32 2147483647, %v362_v29  ;;  %v65_v46 = vand.u32 15, %v25_v6  ;;  %v331_v31 = vsub.f32 %v258_v42, %v971_v2  ;;  %v333_v54 = vsub.f32 %v260_v63, %v1018_v15 }
  0xac   :  { %vm1324_vm7 = vcmp.ge.s32.totalorder %v108_v10, 16  ;;  %v369_v43 = vand.u32 2147483647, %v357_v56  ;;  %v368_v23 = vand.u32 2147483647, %v356_v51  ;;  %v304_v42 = vsel %vm293_vm2, %v1251_v37, %v1200_v36 }
  0xad   :  { %v1284_v30 = vadd.f32 %v374_v24, %v350_v49  ;;  %v302_v49 = vsel %vm293_vm2, %v1200_v36, %v1133_v53  ;;  %v257_v53 = vsel %vm1300_vm6, %v243_v44, 0.0  ;;  %v491_v10 = vsel %vm1203_vm1, %v486_v35, 0.0 }
  0xae   :  { %v1296_v29 = vpop.permute.xlu1 %466  ;;  %v1298_v47 = vpop.permute.xlu2 %287  ;;  %v355_v6 = vsub.f32 %v302_v49, %v971_v2  ;;  %v344_v44 = vand.u32 2147483647, %v332_v17  ;;  %v58_v56 = vand.u32 15, %v1305_v52  ;;  %vm1342_vm8 = vcmp.ne.s32.totalorder %v65_v46, 0 }
  0xaf   :  { %1676 = vst [vmem:[#allocation18_spill] sm:$0xff] %v1284_v30  ;;  %v463_v16 = vpop.permute.xlu0 %462  ;;  %v343_v15 = vand.u32 2147483647, %v331_v31  ;;  %v330_v51 = vsub.f32 %v257_v53, %v973_v3  ;;  %v318_v35 = vsel %vm1324_vm7, %v304_v42, 0.0  ;;  %v394_v24 = vrot.slane %v1016_v14, 4 }
  0xb0   :  { %1677 = vst [vmem:[#allocation19_spill] sm:$0xff] %v1296_v29  ;;  %v482_v30 = vsel %vm232_vm0, %v463_v16, %v1296_v29  ;;  %v484_v21 = vsel %vm232_vm0, %v1170_v18, %v463_v16  ;;  %v345_v18 = vand.u32 2147483647, %v333_v54  ;;  %v367_v16 = vand.u32 2147483647, %v355_v6 }
  0xb1   :  { %v493_v63 = vsel %vm1267_vm5, %v482_v30, 0.0  ;;  %v492_v36 = vsel %vm1226_vm3, %v484_v21, 0.0  ;;  %v617_v30 = vsub.f32 %v491_v10, %v1160_v5  ;;  %v380_v29 = vadd.f32 %v368_v23, %v344_v44 }
  0xb2   :  { %v619_v17 = vsub.f32 %v493_v63, %v1165_v12  ;;  %v381_v25 = vadd.f32 %v369_v43, %v345_v18  ;;  %v398_v21 = vsel %vm396_vm9, %v969_v1, %v391_v7  ;;  %v618_v53 = vsub.f32 %v492_v36, %v1163_v9  ;;  %v1372_v7 = vld.sshfl [vmem:[#allocation1 + $0x38] sm:$0xff pattern:$0x75316420] }
  0xb3   :  { %v354_v12 = vsub.f32 %v318_v35, %v973_v3  ;;  %v390_v1 = vrot.slane %v971_v2, 4  ;;  %v629_v9 = vand.u32 2147483647, %v617_v30  ;;  %v379_v44 = vadd.f32 %v367_v16, %v343_v15  ;;  %v1376_v35 = vld.sshfl [vmem:[#allocation1 + $0x30] sm:$0xff pattern:$0x75316420] }
  0xb4   :  { %v712_v18 = vperm.slane %v381_v25, 0  ;;  %v410_v36 = vsub.f32 %v1008_v11, %v398_v21  ;;  %652 = vst [vmem:[#allocation1 + $0x30] ss:$2 sm:$0xff] %v1074_v33  ;;  %vm1379_vm10 = vcmp.ne.s32.totalorder %v58_v56, 0  ;;  %v711_v15 = vperm.slane %v380_v29, 0  ;;  %v1702_v2 = vld [vmem:[#allocation12_spill] sm:$0xff] }
  0xb5   :  { %v366_v25 = vand.u32 2147483647, %v354_v12 }
  0xb6   :  { %v544_v46 = vpop.permute.xlu1 %543  ;;  %v1353_v38 = vpop.permute.xlu2 %460 }
  0xb7   :  { %v563_v31 = vsel %vm293_vm2, %v544_v46, %v1213_v45  ;;  %v540_v54 = vpop.permute.xlu0 %539 }
  0xb8   :  { %v676_v6 = vsub.f32 %v563_v31, %v1209_v40  ;;  %v565_v5 = vsel %vm293_vm2, %v540_v54, %v544_v46  ;;  %v567_v23 = vsel %vm293_vm2, %v1197_v34, %v540_v54  ;;  %v631_v40 = vand.u32 2147483647, %v619_v17 }
  0xb9   :  { %v573_v43 = vsel %vm1247_vm4, %v565_v5, 0.0  ;;  %v674_v42 = vsub.f32 %v567_v23, %v1222_v57  ;;  %v630_v31 = vand.u32 2147483647, %v618_v53  ;;  %v342_v57 = vand.u32 2147483647, %v330_v51 }
  0xba   :  { %v688_v10 = vand.u32 2147483647, %v676_v6  ;;  %v675_v63 = vsub.f32 %v573_v43, %v1211_v41  ;;  %v262_v41 = vsel %vm1342_vm8, %v1175_v19, 0.0  ;;  %v710_v53 = vperm.slane %v379_v44, 0 }
  0xbb   :  { %v686_v46 = vand.u32 2147483647, %v674_v42  ;;  %v734_v6 = vmul.f32 %v410_v36, %v410_v36  ;;  %v397_v19 = vsel %vm396_vm9, %v973_v3, %v390_v1  ;;  %v378_v42 = vadd.f32 %v366_v25, %v342_v57 }
  0xbc   :  { %v700_v54 = vadd.f32 %v688_v10, %v631_v40  ;;  %v687_v5 = vand.u32 2147483647, %v675_v63  ;;  %v136_v3 = vand.u32 255, %v1305_v52 }
  0xbd   :  { %v698_v16 = vadd.f32 %v686_v46, %v629_v9  ;;  %v1415_v46 = vld.sshfl [vmem:[#allocation1 + $0x18] sm:$0xff pattern:$0x75316420] }
  0xbe   :  { %v724_v11 = vsub.f32 %v700_v54, %v712_v18  ;;  %v699_v30 = vadd.f32 %v687_v5, %v630_v31  ;;  %v1386_v17 = vpop.permute.xlu1 %555  ;;  %v1388_v21 = vpop.permute.xlu2 %470  ;;  %v1409_v18 = vld.sshfl [vmem:[#allocation1 + $0x10] sm:$0xff pattern:$0x75316420]  ;;  %v335_v31 = vsub.f32 %v262_v41, %v1037_v22  ;;  %v409_v54 = vsub.f32 %v982_v4, %v397_v19 }
  0xbf   :  { %v569_v56 = vsel %vm293_vm2, %v1386_v17, %v1197_v34  ;;  %v1396_v51 = vpop.permute.xlu0 %474  ;;  %v722_v40 = vsub.f32 %v698_v16, %v710_v53  ;;  %vm1419_vm11 = vcmp.ge.s32.totalorder %v136_v3, 16  ;;  %v1441_v3 = vld.sshfl [vmem:[#allocation1 + $0x8] sm:$0xff pattern:$0x75316420] }
  0xc0   :  { %v742_v29 = vand.u32 2147483647, %v724_v11  ;;  %v723_v23 = vsub.f32 %v699_v30, %v711_v15  ;;  %v571_v12 = vsel %vm1324_vm7, %v569_v56, 0.0  ;;  %v488_v43 = vsel %vm232_vm0, %v1396_v51, %v1242_v27 }
  0xc1   :  { %v673_v9 = vsub.f32 %v571_v12, %v1224_v61  ;;  %v490_v34 = vsel %vm1300_vm6, %v488_v43, 0.0  ;;  %v261_v27 = vsel %vm1379_vm10, %v1158_v0, 0.0  ;;  %v740_v57 = vand.u32 2147483647, %v722_v40 }
  0xc2   :  { %v764_v1 = vrot.slane %v742_v29, 4  ;;  %v741_v10 = vand.u32 2147483647, %v723_v23  ;;  %v616_v63 = vsub.f32 %v490_v34, %v1145_v59  ;;  %v709_v59 = vperm.slane %v378_v42, 0 }
  0xc3   :  { %v685_v44 = vand.u32 2147483647, %v673_v9  ;;  %v334_v0 = vsub.f32 %v261_v27, %v1014_v13  ;;  %v347_v56 = vand.u32 2147483647, %v335_v31  ;;  %v733_v19 = vmul.f32 %v409_v54, %v409_v54 }
  0xc4   :  { %v770_v36 = vsel %vm396_vm9, %v741_v10, %v764_v1  ;;  %v628_v61 = vand.u32 2147483647, %v616_v63  ;;  %v763_v23 = vrot.slane %v740_v57, 4  ;;  %v1439_v34 = vld.sshfl [vmem:[#allocation1] sm:$0xff pattern:$0x75316420] }
  0xc5   :  { %v782_v52 = vadd.f32 %v770_v36, %v734_v6  ;;  %v263_v10 = vsel %vm1300_vm6, %v1143_v58, 0.0  ;;  %v266_v58 = vsel %vm1267_vm5, %v1151_v62, 0.0  ;;  %v1688_v62 = vld [vmem:[#allocation9_spill] sm:$0xff] }
  0xc6   :  { %v697_v25 = vadd.f32 %v685_v44, %v628_v61  ;;  %v286_v15 = vpop.permute.xlu1 %285  ;;  %v1423_v11 = vpop.permute.xlu2 %537  ;;  %v336_v36 = vsub.f32 %v263_v10, %v994_v8 }
  0xc7   :  { %v294_v16 = vsel %vm293_vm2, %v286_v15, %v1251_v37  ;;  %v296_v4 = vsel %vm293_vm2, %v1147_v60, %v286_v15  ;;  %v284_v41 = vpop.permute.xlu0 %283  ;;  %795 = vst [vmem:[#allocation1 + $0x10] ss:$2 sm:$0xff] %v782_v52  ;;  %v346_v37 = vand.u32 2147483647, %v334_v0 }
  0xc8   :  { %v721_v30 = vsub.f32 %v697_v25, %v709_v59  ;;  %v322_v53 = vsel %vm1419_vm11, %v296_v4, 0.0  ;;  %v359_v6 = vsub.f32 %v294_v16, %v1037_v22  ;;  %v348_v54 = vand.u32 2147483647, %v336_v36 }
  0xc9   :  { %v358_v29 = vsub.f32 %v322_v53, %v1014_v13  ;;  %v267_v25 = vsel %vm1379_vm10, %v1183_v26, 0.0  ;;  %v299_v15 = vsel %vm293_vm2, %v1244_v28, %v284_v41  ;;  %v339_v4 = vsub.f32 %v266_v58, %v1016_v14  ;;  %v1689_v53 = vld [vmem:[#allocation19_spill] sm:$0xff]  ;;  %v1694_v58 = vld [vmem:[#allocation16_spill] sm:$0xff] }
  0xca   :  { %v739_v12 = vand.u32 2147483647, %v721_v30  ;;  %v371_v43 = vand.u32 2147483647, %v359_v6  ;;  %v268_v30 = vsel %vm1342_vm8, %v1688_v62, 0.0  ;;  %v478_v26 = vsel %vm232_vm0, %v1388_v21, %v1396_v51  ;;  %v1690_v28 = vld [vmem:[#allocation7_spill] sm:$0xff] }
  0xcb   :  { %v370_v42 = vand.u32 2147483647, %v358_v29  ;;  %v480_v6 = vsel %vm232_vm0, %v1689_v53, %v1388_v21  ;;  %v495_v51 = vsel %vm1342_vm8, %v478_v26, 0.0  ;;  %v351_v10 = vand.u32 2147483647, %v339_v4 }
  0xcc   :  { %v769_v9 = vsel %vm396_vm9, %v739_v12, %v763_v23  ;;  %v1437_v60 = vadd.f32 %v371_v43, %v347_v56  ;;  %v1691_v23 = vld [vmem:[#allocation3_spill] sm:$0xff]  ;;  %v494_v43 = vsel %vm1379_vm10, %v480_v6, 0.0 }
  0xcd   :  { %v781_v1 = vadd.f32 %v769_v9, %v733_v19  ;;  %v1443_v40 = vadd.f32 %v370_v42, %v346_v37  ;;  %v363_v19 = vsub.f32 %v299_v15, %v1016_v14  ;;  %v393_v12 = vrot.slane %v1691_v23, 4  ;;  %v1692_v37 = vld [vmem:[#allocation6_spill] sm:$0xff]  ;;  %v653_v53 = vld.sshfl [vmem:[#allocation1 + $0x30] sm:$0xff pattern:$0x75316420] }
  0xce   :  { %v457_v63 = vpop.permute.xlu1 %456  ;;  %v1448_v27 = vpop.permute.xlu2 %549  ;;  %v341_v42 = vsub.f32 %v268_v30, %v1692_v37 }
  0xcf   :  { %v292_v44 = vpop.permute.xlu0 %291  ;;  %793 = vst [vmem:[#allocation1] ss:$2 sm:$0xff] %v781_v1  ;;  %v487_v21 = vsel %vm232_vm0, %v457_v63, %v1353_v38 }
  0xd0   :  { %v305_v61 = vsel %vm293_vm2, %v292_v44, %v1195_v32  ;;  %v297_v32 = vsel %vm293_vm2, %v284_v41, %v1298_v47  ;;  %v340_v41 = vsub.f32 %v267_v25, %v1690_v28  ;;  %v1511_v25 = vsub.f32 %v495_v51, %v1694_v58  ;;  %v1699_v58 = vld [vmem:[#allocation2_spill] sm:$0xff] }
  0xd1   :  { %v324_v31 = vsel %vm1324_vm7, %v305_v61, 0.0  ;;  %v328_v56 = vsel %vm1419_vm11, %v297_v32, 0.0  ;;  %v375_v61 = vand.u32 2147483647, %v363_v19  ;;  %v497_v15 = vsel %vm1203_vm1, %v487_v21, 0.0 }
  0xd2   :  { %v360_v52 = vsub.f32 %v324_v31, %v994_v8  ;;  %v364_v9 = vsub.f32 %v328_v56, %v1690_v28  ;;  %v352_v36 = vand.u32 2147483647, %v340_v41  ;;  %v295_v4 = vsel %vm293_vm2, %v1298_v47, %v292_v44  ;;  %v1696_v56 = vld [vmem:[#allocation17_spill] sm:$0xff] }
  0xd3   :  { %v353_v41 = vand.u32 2147483647, %v341_v42  ;;  %v716_v19 = vperm.slane %v1696_v56, 0  ;;  %v623_v47 = vsub.f32 %v497_v15, %v1372_v7  ;;  %v1697_v42 = vld [vmem:[#allocation18_spill] sm:$0xff]  ;;  %v633_v7 = vand.u32 2147483647, %v1511_v25 }
  0xd4   :  { %v372_v59 = vand.u32 2147483647, %v360_v52  ;;  %v400_v52 = vsel %vm396_vm9, %v994_v8, %v393_v12  ;;  %v387_v12 = vadd.f32 %v375_v61, %v351_v10  ;;  %v1698_v61 = vld [vmem:[#allocation11_spill] sm:$0xff]  ;;  %v401_v32 = vsel %vm396_vm9, %v1699_v58, %v394_v24 }
  0xd5   :  { %v412_v23 = vsub.f32 %v1074_v33, %v400_v52 }
  0xd6   :  { %v1460_v57 = vpop.permute.xlu1 %468  ;;  %v1471_v0 = vadd.f32 %v372_v59, %v348_v54  ;;  %v1489_v29 = vpop.permute.xlu2 %557  ;;  %v1693_v54 = vld [vmem:[#allocation15_spill] sm:$0xff]  ;;  %v718_v10 = vperm.slane %v387_v12, 0 }
  0xd7   :  { %v465_v16 = vpop.permute.xlu0 %464  ;;  %v570_v1 = vsel %vm293_vm2, %v1489_v29, %v1423_v11  ;;  %v1508_v59 = vsub.f32 %v494_v43, %v1693_v54  ;;  %v365_v43 = vsub.f32 %v295_v4, %v1692_v37  ;;  %v1547_v39 = vmul.f32 %v412_v23, %v412_v23  ;;  %v654_v54 = vld.sshfl [vmem:[#allocation1 + $0x38] sm:$0xff pattern:$0x75316420] }
  0xd8   :  { %v483_v8 = vsel %vm232_vm0, %v465_v16, %v1460_v57  ;;  %v577_v6 = vsel %vm1324_vm7, %v570_v1, 0.0  ;;  %v485_v44 = vsel %vm232_vm0, %v1353_v38, %v465_v16  ;;  %v714_v1 = vperm.slane %v1437_v60, 0 }
  0xd9   :  { %v499_v50 = vsel %vm1267_vm5, %v483_v8, 0.0  ;;  %v679_v21 = vsub.f32 %v577_v6, %v653_v53  ;;  %v632_v33 = vand.u32 2147483647, %v1508_v59  ;;  %v713_v38 = vperm.slane %v1443_v40, 0 }
  0xda   :  { %v498_v14 = vsel %vm1226_vm3, %v485_v44, 0.0  ;;  %v625_v52 = vsub.f32 %v499_v50, %v1698_v61 }
  0xdb   :  { %v691_v8 = vand.u32 2147483647, %v679_v21 }
  0xde   :  { %v477_v31 = vpop.permute.xlu1 %476 }
  0xdf   :  { %v489_v62 = vsel %vm232_vm0, %v477_v31, %v457_v63  ;;  %v473_v30 = vpop.permute.xlu0 %472  ;;  %v376_v63 = vand.u32 2147483647, %v364_v9  ;;  %v717_v9 = vperm.slane %v1697_v42, 0 }
  0xe0   :  { %v496_v26 = vsel %vm1300_vm6, %v489_v62, 0.0  ;;  %v377_v62 = vand.u32 2147483647, %v365_v43  ;;  %v481_v23 = vsel %vm232_vm0, %v1460_v57, %v473_v30  ;;  %v637_v43 = vand.u32 2147483647, %v625_v52 }
  0xe1   :  { %v622_v51 = vsub.f32 %v496_v26, %v1376_v35  ;;  %v1543_v16 = vadd.f32 %v376_v63, %v352_v36  ;;  %v635_v35 = vand.u32 2147483647, %v623_v47  ;;  %v1700_v36 = vld [vmem:[#allocation10_spill] sm:$0xff]  ;;  %v1701_v47 = vld [vmem:[#allocation4_spill] sm:$0xff]  ;;  %v500_v61 = vsel %vm1379_vm10, %v481_v23, 0.0 }
  0xe2   :  { %v624_v53 = vsub.f32 %v498_v14, %v1700_v36  ;;  %v413_v44 = vsub.f32 %v1701_v47, %v401_v32  ;;  %v1570_v21 = vadd.f32 %v377_v62, %v353_v41  ;;  %v715_v52 = vperm.slane %v1471_v0, 0  ;;  %v1703_v47 = vld [vmem:[#allocation13_spill] sm:$0xff] }
  0xe3   :  { %v634_v4 = vand.u32 2147483647, %v622_v51  ;;  %v395_v32 = vrot.slane %v1692_v37, 4 }
  0xe4   :  { %v636_v57 = vand.u32 2147483647, %v624_v53 }
  0xe5   :  { %v703_v42 = vadd.f32 %v691_v8, %v634_v4  ;;  %v626_v4 = vsub.f32 %v500_v61, %v1702_v2 }
  0xe6   :  { %v546_v15 = vpop.permute.xlu1 %545 }
  0xe7   :  { %v542_v26 = vpop.permute.xlu0 %541  ;;  %v564_v20 = vsel %vm293_vm2, %v546_v15, %v1448_v27  ;;  %v727_v8 = vsub.f32 %v703_v42, %v715_v52  ;;  %v798_v42 = vld.sshfl [vmem:[#allocation1] sm:$0xff pattern:$0x75316420]  ;;  %v402_v52 = vsel %vm396_vm9, %v1690_v28, %v395_v32 }
  0xe8   :  { %v568_v6 = vsel %vm293_vm2, %v1423_v11, %v542_v26  ;;  %v566_v56 = vsel %vm293_vm2, %v542_v26, %v546_v15  ;;  %v682_v63 = vsub.f32 %v564_v20, %v1441_v3  ;;  %v392_v11 = vrot.slane %v1037_v22, 4  ;;  %v649_v20 = vld.sshfl [vmem:[#allocation1 + $0x20] sm:$0xff pattern:$0x75316420] }
  0xe9   :  { %v680_v12 = vsub.f32 %v568_v6, %v654_v54  ;;  %v579_v24 = vsel %vm1247_vm4, %v566_v56, 0.0  ;;  %v479_v3 = vsel %vm232_vm0, %v473_v30, %v477_v31  ;;  %v650_v30 = vld.sshfl [vmem:[#allocation1 + $0x28] sm:$0xff pattern:$0x75316420]  ;;  %v745_v23 = vand.u32 2147483647, %v727_v8 }
  0xea   :  { %v681_v50 = vsub.f32 %v579_v24, %v1439_v34  ;;  %v694_v51 = vand.u32 2147483647, %v682_v63  ;;  %v737_v34 = vmul.f32 %v413_v44, %v413_v44  ;;  %v501_v22 = vsel %vm1342_vm8, %v479_v3, 0.0  ;;  %v1705_v28 = vld [vmem:[#allocation5_spill] sm:$0xff] }
  0xeb   :  { %v692_v14 = vand.u32 2147483647, %v680_v12  ;;  %v399_v31 = vsel %vm396_vm9, %v1014_v13, %v392_v11  ;;  %v627_v44 = vsub.f32 %v501_v22, %v1703_v47  ;;  %v801_v22 = vld.sshfl [vmem:[#allocation1 + $0x18] sm:$0xff pattern:$0x75316420]  ;;  %v414_v32 = vsub.f32 %v1705_v28, %v402_v52 }
  0xec   :  { %v693_v54 = vand.u32 2147483647, %v681_v50  ;;  %v706_v55 = vadd.f32 %v694_v51, %v637_v43  ;;  %v1704_v43 = vld [vmem:[#allocation8_spill] sm:$0xff]  ;;  %v638_v51 = vand.u32 2147483647, %v626_v4  ;;  %vm935_vm0 = vcmask 1042432  }
  0xed   :  { %v704_v58 = vadd.f32 %v692_v14, %v635_v35  ;;  %v411_v50 = vsub.f32 %v1704_v43, %v399_v31  ;;  %v639_v25 = vand.u32 2147483647, %v627_v44 }
  0xee   :  { %v705_v41 = vadd.f32 %v693_v54, %v636_v57  ;;  %v730_v15 = vsub.f32 %v706_v55, %v718_v10  ;;  %v554_v62 = vpop.permute.xlu1 %553  ;;  %v799_v57 = vld.sshfl [vmem:[#allocation1 + $0x8] sm:$0xff pattern:$0x75316420]  ;;  %v719_v54 = vperm.slane %v1543_v16, 0 }
  0xef   :  { %v728_v26 = vsub.f32 %v704_v58, %v716_v19  ;;  %v552_v0 = vpop.permute.xlu0 %551  ;;  %v562_v37 = vsel %vm293_vm2, %v1448_v27, %v554_v62  ;;  %v800_v58 = vld.sshfl [vmem:[#allocation1 + $0x10] sm:$0xff pattern:$0x75316420] }
  0xf0   :  { %v729_v35 = vsub.f32 %v705_v41, %v717_v9  ;;  %v748_v49 = vand.u32 2147483647, %v730_v15  ;;  %v559_v10 = vsel %vm293_vm2, %v552_v0, %v1386_v17  ;;  %v561_v13 = vsel %vm293_vm2, %v1213_v45, %v552_v0 }
  0xf1   :  { %v746_v36 = vand.u32 2147483647, %v728_v26  ;;  %v575_v19 = vsel %vm1419_vm11, %v561_v13, 0.0  ;;  %v678_v53 = vsub.f32 %v559_v10, %v650_v30  ;;  %v581_v6 = vsel %vm1419_vm11, %v562_v37, 0.0 }
  0xf2   :  { %v747_v56 = vand.u32 2147483647, %v729_v35  ;;  %v767_v27 = vrot.slane %v748_v49, 4  ;;  %v677_v9 = vsub.f32 %v575_v19, %v649_v20  ;;  %v683_v63 = vsub.f32 %v581_v6, %v1409_v18 }
  0xf3   :  { %v766_v12 = vrot.slane %v746_v36, 4  ;;  %v690_v17 = vand.u32 2147483647, %v678_v53  ;;  %v560_v45 = vsel %vm293_vm2, %v554_v62, %v1489_v29  ;;  %v840_v31 = vsel %vm396_vm9, %v800_v58, 0.0 }
  0xf4   :  { %v773_v24 = vsel %vm396_vm9, %v747_v56, %v767_v27  ;;  %v689_v5 = vand.u32 2147483647, %v677_v9  ;;  %v684_v29 = vsub.f32 %v560_v45, %v1415_v46  ;;  %v695_v61 = vand.u32 2147483647, %v683_v63 }
  0xf5   :  { %v772_v11 = vsel %vm396_vm9, %v745_v23, %v766_v12  ;;  %v785_v3 = vadd.f32 %v773_v24, %v737_v34  ;;  %v702_v18 = vadd.f32 %v690_v17, %v633_v7  ;;  %v735_v34 = vmul.f32 %v411_v50, %v411_v50 }
  0xf6   :  { %v784_v14 = vadd.f32 %v772_v11, %v1547_v39  ;;  %v701_v48 = vadd.f32 %v689_v5, %v632_v33  ;;  %v696_v39 = vand.u32 2147483647, %v684_v29  ;;  %v707_v59 = vadd.f32 %v695_v61, %v638_v51 }
  0xf7   :  { %808 = vst [vmem:[#allocation1] ss:$2 sm:$0xff] %v785_v3  ;;  %v726_v55 = vsub.f32 %v702_v18, %v714_v1  ;;  %v720_v33 = vperm.slane %v1570_v21, 0  ;;  %v833_v1 = vsel %vm396_vm9, %v799_v57, 0.0  ;;  %v847_v21 = vsel %vm396_vm9, %v801_v22, 0.0 }
  0xf8   :  { %805 = vst [vmem:[#allocation1 + $0x30] ss:$2 sm:$0xff] %v784_v14  ;;  %v725_v7 = vsub.f32 %v701_v48, %v713_v38  ;;  %v708_v41 = vadd.f32 %v696_v39, %v639_v25  ;;  %v731_v60 = vsub.f32 %v707_v59, %v719_v54  ;;  %v826_v38 = vsel %vm396_vm9, %v798_v42, 0.0 }
  0xf9   :  { %v744_v46 = vand.u32 2147483647, %v726_v55  ;;  %v834_v2 = vrot.slane %v833_v1, 4  ;;  %v738_v37 = vmul.f32 %v414_v32, %v414_v32  ;;  %v841_v19 = vrot.slane %v840_v31, 4 }
  0xfa   :  { %v743_v16 = vand.u32 2147483647, %v725_v7  ;;  %v732_v40 = vsub.f32 %v708_v41, %v720_v33  ;;  %v749_v62 = vand.u32 2147483647, %v731_v60  ;;  %v827_v56 = vrot.slane %v826_v38, 4 }
  0xfb   :  { %v765_v15 = vrot.slane %v744_v46, 4  ;;  %v835_v27 = vadd.f32 %v834_v2, %v833_v1  ;;  %v848_v17 = vrot.slane %v847_v21, 4  ;;  %v842_v5 = vadd.f32 %v841_v19, %v840_v31 }
  0xfc   :  { %v750_v8 = vand.u32 2147483647, %v732_v40  ;;  %v828_v43 = vadd.f32 %v827_v56, %v826_v38 }
  0xfd   :  { %v771_v30 = vsel %vm396_vm9, %v743_v16, %v765_v15  ;;  %v836_v50 = vrot.slane %v835_v27, 2  ;;  %v849_v18 = vadd.f32 %v848_v17, %v847_v21  ;;  %v843_v7 = vrot.slane %v842_v5, 2 }
  0xfe   :  { %v783_v4 = vadd.f32 %v771_v30, %v735_v34  ;;  %v810_v26 = vld.sshfl [vmem:[#allocation1] sm:$0xff pattern:$0x75316420]  ;;  %v768_v10 = vrot.slane %v750_v8, 4  ;;  %v829_v52 = vrot.slane %v828_v43, 2 }
  0xff   :  { %v806_v20 = vld.sshfl [vmem:[#allocation1 + $0x30] sm:$0xff pattern:$0x75316420]  ;;  %v807_v0 = vld.sshfl [vmem:[#allocation1 + $0x38] sm:$0xff pattern:$0x75316420]  ;;  %v837_v25 = vadd.f32 %v836_v50, %v835_v27  ;;  %v844_v28 = vadd.f32 %v843_v7, %v842_v5 }
 0x100   :  { %v868_v35 = vsel %vm396_vm9, %v806_v20, 0.0  ;;  %v875_v49 = vsel %vm396_vm9, %v807_v0, 0.0  ;;  %797 = vst [vmem:[#allocation1 + $0x20] ss:$2 sm:$0xff] %v783_v4  ;;  %v882_v13 = vsel %vm396_vm9, %v810_v26, 0.0  ;;  %v774_v9 = vsel %vm396_vm9, %v749_v62, %v768_v10 }
 0x101   :  { %v876_v36 = vrot.slane %v875_v49, 4  ;;  %v811_v53 = vld.sshfl [vmem:[#allocation1 + $0x8] sm:$0xff pattern:$0x75316420]  ;;  %v883_v6 = vrot.slane %v882_v13, 4  ;;  %v869_v23 = vrot.slane %v868_v35, 4  ;;  %v786_v45 = vadd.f32 %v774_v9, %v738_v37 }
 0x102   :  { %v889_v63 = vsel %vm396_vm9, %v811_v53, 0.0  ;;  %v850_v46 = vrot.slane %v849_v18, 2  ;;  %v838_v15 = vrot.slane %v837_v25, 1  ;;  %v830_v26 = vadd.f32 %v829_v52, %v828_v43 }
 0x103   :  { %v877_v12 = vadd.f32 %v876_v36, %v875_v49  ;;  %v884_v47 = vadd.f32 %v883_v6, %v882_v13  ;;  %v890_v44 = vrot.slane %v889_v63, 4  ;;  %809 = vst [vmem:[#allocation1 + $0x10] ss:$2 sm:$0xff] %v786_v45  ;;  %v870_v11 = vadd.f32 %v869_v23, %v868_v35 }
 0x104   :  { %v851_v30 = vadd.f32 %v850_v46, %v849_v18  ;;  %v839_v37 = vadd.f32 %v838_v15, %v837_v25  ;;  %v845_v35 = vrot.slane %v844_v28, 1  ;;  %v831_v27 = vrot.slane %v830_v26, 1 }
 0x105   :  { %v878_v24 = vrot.slane %v877_v12, 2  ;;  %v891_v51 = vadd.f32 %v890_v44, %v889_v63  ;;  %v885_v48 = vrot.slane %v884_v47, 2  ;;  %v871_v39 = vrot.slane %v870_v11, 2 }
 0x106   :  { %v852_v36 = vrot.slane %v851_v30, 1  ;;  %v1706_v25 = vlaneseq }
 0x107   :  { %v802_v3 = vld.sshfl [vmem:[#allocation1 + $0x20] sm:$0xff pattern:$0x75316420]  ;;  %v803_v42 = vld.sshfl [vmem:[#allocation1 + $0x28] sm:$0xff pattern:$0x75316420]  ;;  %v879_v29 = vadd.f32 %v878_v24, %v877_v12  ;;  %v886_v16 = vadd.f32 %v885_v48, %v884_v47  ;;  %v872_v40 = vadd.f32 %v871_v39, %v870_v11  ;;  %v846_v12 = vadd.f32 %v845_v35, %v844_v28 }
 0x108   :  { %v854_v14 = vsel %vm396_vm9, %v802_v3, 0.0  ;;  %v861_v57 = vsel %vm396_vm9, %v803_v42, 0.0  ;;  %v892_v55 = vrot.slane %v891_v51, 2  ;;  %v853_v44 = vadd.f32 %v852_v36, %v851_v30 }
 0x109   :  { %v855_v61 = vrot.slane %v854_v14, 4  ;;  %v862_v54 = vrot.slane %v861_v57, 4  ;;  %v880_v22 = vrot.slane %v879_v29, 1  ;;  %v887_v2 = vrot.slane %v886_v16, 1 }
 0x10a   :  { %v812_v58 = vld.sshfl [vmem:[#allocation1 + $0x10] sm:$0xff pattern:$0x75316420]  ;;  %v813_v34 = vld.sshfl [vmem:[#allocation1 + $0x18] sm:$0xff pattern:$0x75316420]  ;;  %v893_v1 = vadd.f32 %v892_v55, %v891_v51  ;;  %v832_v51 = vadd.f32 %v831_v27, %v830_v26 }
 0x10b   :  { %v856_v59 = vadd.f32 %v855_v61, %v854_v14  ;;  %v863_v33 = vadd.f32 %v862_v54, %v861_v57  ;;  %v896_v32 = vsel %vm396_vm9, %v812_v58, 0.0  ;;  %v903_v31 = vsel %vm396_vm9, %v813_v34, 0.0 }
 0x10c   :  { %v897_v21 = vrot.slane %v896_v32, 4  ;;  %v904_v4 = vrot.slane %v903_v31, 4  ;;  %v881_v8 = vadd.f32 %v880_v22, %v879_v29  ;;  %v894_v20 = vrot.slane %v893_v1, 1 }
 0x10d   :  { %v857_v41 = vrot.slane %v856_v59, 2  ;;  %v864_v60 = vrot.slane %v863_v33, 2  ;;  %v873_v10 = vrot.slane %v872_v40, 1  ;;  %v888_v6 = vadd.f32 %v887_v2, %v886_v16 }
 0x10e   :  { %v898_v0 = vadd.f32 %v897_v21, %v896_v32  ;;  %v905_v49 = vadd.f32 %v904_v4, %v903_v31  ;;  %v911_v9 = vadd.f32 %v881_v8, %v839_v37  ;;  %v895_v63 = vadd.f32 %v894_v20, %v893_v1 }
 0x10f   :  { %v858_v38 = vadd.f32 %v857_v41, %v856_v59  ;;  %v865_v62 = vadd.f32 %v864_v60, %v863_v33  ;;  %v874_v45 = vadd.f32 %v873_v10, %v872_v40  ;;  %v912_v5 = vadd.f32 %v888_v6, %v846_v12 }
 0x110   :  { %v899_v19 = vrot.slane %v898_v0, 2  ;;  %v906_v56 = vrot.slane %v905_v49, 2  ;;  %v922_v11 = vrot.slane %v911_v9, 7  ;;  %v913_v42 = vadd.f32 %v895_v63, %v853_v44 }
 0x111   :  { %v859_v13 = vrot.slane %v858_v38, 1  ;;  %v866_v53 = vrot.slane %v865_v62, 1  ;;  %v910_v14 = vadd.f32 %v874_v45, %v832_v51  ;;  %v923_v29 = vrot.slane %v912_v5, 6 }
 0x112   :  { %v900_v23 = vadd.f32 %v899_v19, %v898_v0  ;;  %v907_v17 = vadd.f32 %v906_v56, %v905_v49  ;;  %v924_v54 = vrot.slane %v913_v42, 5  ;;  %vm940_vm1 = vcmp.lt.s32.totalorder %v1706_v25, 768 }
 0x113   :  { %v860_v47 = vadd.f32 %v859_v13, %v858_v38  ;;  %v867_v43 = vadd.f32 %v866_v53, %v865_v62  ;;  %v928_v61 = vsel %vm927_vm12, %v910_v14, %v922_v11 }
 0x114   :  { %v901_v24 = vrot.slane %v900_v23, 1  ;;  %v908_v50 = vrot.slane %v907_v17, 1  ;;  %v930_v39 = vsel %vm929_vm13, %v928_v61, %v923_v29 }
 0x116   :  { %v902_v3 = vadd.f32 %v901_v24, %v900_v23  ;;  %v909_v18 = vadd.f32 %v908_v50, %v907_v17 }
 0x118   :  { %v914_v57 = vadd.f32 %v902_v3, %v860_v47  ;;  %v915_v48 = vadd.f32 %v909_v18, %v867_v43 }
 0x11a   :  { %v925_v55 = vrot.slane %v914_v57, 4  ;;  %v926_v52 = vrot.slane %v915_v48, 3 }
 0x11c   :  { %v932_v7 = vsel %vm931_vm14, %v924_v54, %v925_v55 }
 0x11d   :  { %v934_v59 = vsel %vm933_vm15, %v932_v7, %v926_v52 }
 0x11e   :  { %v936_v33 = vsel %vm935_vm0, %v930_v39, %v934_v59 }
 0x11f   :  { %942 = vst.msk [vmem:[%s1639_s2] sm:$0x3f] %vm940_vm1, %v936_v33 }

</bundles_post_ra>
